<compile_context>
chip_gen: v7x
topology: tpu7x:2x2x1
jax: 0.10.0
libtpu: 0.0.40
codegen_flags: <defaults>
</compile_context>

<pallas_src>
import jax
import jax.numpy as jnp
from jax.experimental import pallas as pl
from jax.experimental.pallas import tpu as pltpu


def _round_up(v, m):
    return (v + m - 1) // m * m


def gru_net_kernel(x_ref, wih_ref, whh_ref, bih_ref, bhn_ref, wfc_ref, bfc_ref, out_ref):
    """One batch tile of the GRU recurrence + final Linear.

    x_ref:   (T, TB, Ip)   time-major input tile (zero padded batch/feature dims)
    wih_ref: (Ip, 3*Hp)    input->gate weights, gate blocks [r|z|n], 128-lane aligned
    whh_ref: (Hp, 3*Hp)    hidden->gate weights, same gate-aligned layout
    bih_ref: (1, 3*Hp)     combined biases [b_ir+b_hr | b_iz+b_hz | b_in]
    bhn_ref: (1, Hp)       b_hn (must stay inside r * (W_hn h + b_hn))
    wfc_ref: (Hp, Op)      final linear weight (transposed)
    bfc_ref: (1, Op)       final linear bias
    out_ref: (TB, Op)      fc(h_T)
    """
    T, TB, Ip = x_ref.shape
    Hp = whh_ref.shape[0]

    # ---- hoisted input projection: one big MXU matmul for all T steps at once ----
    x2d = x_ref[...].reshape(T * TB, Ip)                         # (T*TB, Ip)
    gi_all = jnp.dot(x2d, wih_ref[...],
                     preferred_element_type=jnp.float32) + bih_ref[...]   # (T*TB, 3Hp)

    whh = whh_ref[...]
    bhn = jnp.broadcast_to(bhn_ref[...], (TB, Hp))               # hoisted broadcast

    h = jnp.zeros((TB, Hp), dtype=jnp.float32)                   # h0 = zeros, as in module
    # T is small & static -> unrolled Python loop (traced once).
    # TODO(synk): switch to lax.fori_loop(..., unroll=k) if T becomes large/configurable.
    for t in range(T):
        gi = gi_all[t * TB:(t + 1) * TB, :]                      # sublane-aligned static slice
        gh = jnp.dot(h, whh, preferred_element_type=jnp.float32)  # only matmul on serial path
        r = jax.nn.sigmoid(gi[:, 0:Hp] + gh[:, 0:Hp])            # 128-lane aligned gate slices
        z = jax.nn.sigmoid(gi[:, Hp:2 * Hp] + gh[:, Hp:2 * Hp])
        n = jnp.tanh(gi[:, 2 * Hp:3 * Hp] + r * (gh[:, 2 * Hp:3 * Hp] + bhn))
        h = (1.0 - z) * n + z * h

    # out = fc(out[:, -1, :])  (last-timestep hidden is exactly h after the loop)
    y = jnp.dot(h, wfc_ref[...], preferred_element_type=jnp.float32) + bfc_ref[...]
    out_ref[...] = y.astype(out_ref.dtype)


def gru_net_forward(x, packed):
    """x: (B, T, I) float32 batch-first (like the PyTorch module). Returns (B, output_size)."""
    B, T, I = x.shape
    H = packed["hidden_size"]
    O = packed["output_size"]

    TB = 8                                   # batch tile (sublane-sized)
    Bp = max(_round_up(B, TB), TB)
    Ip = _round_up(I, 128)
    Hp = _round_up(H, 128)
    Op = _round_up(O, 128)

    # Zero-pad batch & feature dims, go time-major so each step is a contiguous (TB, Ip) slab.
    x_p = jnp.zeros((Bp, T, Ip), jnp.float32).at[:B, :, :I].set(x.astype(jnp.float32))
    x_tm = jnp.transpose(x_p, (1, 0, 2))     # (T, Bp, Ip)

    out_p = pl.pallas_call(
        gru_net_kernel,
        out_shape=jax.ShapeDtypeStruct((Bp, Op), jnp.float32),
        grid=(Bp // TB,),
        in_specs=[
            pl.BlockSpec((T, TB, Ip), lambda i: (0, i, 0)),       # x tile per batch block
            pl.BlockSpec((Ip, 3 * Hp), lambda i: (0, 0)),         # W_ih (gate-aligned)
            pl.BlockSpec((Hp, 3 * Hp), lambda i: (0, 0)),         # W_hh (gate-aligned)
            pl.BlockSpec((1, 3 * Hp), lambda i: (0, 0)),          # combined input-side biases
            pl.BlockSpec((1, Hp), lambda i: (0, 0)),              # b_hn
            pl.BlockSpec((Hp, Op), lambda i: (0, 0)),             # W_fc^T
            pl.BlockSpec((1, Op), lambda i: (0, 0)),              # b_fc
        ],
        out_specs=pl.BlockSpec((TB, Op), lambda i: (i, 0)),
        compiler_params=pltpu.CompilerParams(dimension_semantics=("parallel",)),
    )(x_tm, packed["wih_p"], packed["whh_p"], packed["bih_eff"],
      packed["bhn_p"], packed["wfc_p"], packed["bfc_p"])

    return out_p[:B, :O]


def init_params(key, input_size, hidden_size, output_size):
    """Deterministic init with PyTorch param shapes (GRU gate order [r, z, n])."""
    k1, k2, k3, k4, k5, k6 = jax.random.split(key, 6)
    bound = 1.0 / jnp.sqrt(hidden_size)
    w_ih = jax.random.uniform(k1, (3 * hidden_size, input_size),
                              minval=-bound, maxval=bound, dtype=jnp.float32)
    w_hh = jax.random.uniform(k2, (3 * hidden_size, hidden_size),
                              minval=-bound, maxval=bound, dtype=jnp.float32)
    b_ih = jax.random.uniform(k3, (3 * hidden_size,),
                              minval=-bound, maxval=bound, dtype=jnp.float32)
    b_hh = jax.random.uniform(k4, (3 * hidden_size,),
                              minval=-bound, maxval=bound, dtype=jnp.float32)
    w_fc = jax.random.uniform(k5, (output_size, hidden_size),
                              minval=-bound, maxval=bound, dtype=jnp.float32)
    b_fc = jax.random.uniform(k6, (output_size,),
                              minval=-bound, maxval=bound, dtype=jnp.float32)
    return dict(w_ih=w_ih, w_hh=w_hh, b_ih=b_ih, b_hh=b_hh, w_fc=w_fc, b_fc=b_fc)


def pack_params(raw, input_size, hidden_size, output_size):
    """Pack PyTorch-layout params into gate-aligned, lane-padded kernel layout.

    Padding is zero-filled so padded hidden lanes stay exactly zero through the
    recurrence (r_pad*0 = 0, h_pad starts at 0 and decays to 0) and never leak.
    """
    I, H, O = input_size, hidden_size, output_size
    Ip = _round_up(I, 128)
    Hp = _round_up(H, 128)
    Op = _round_up(O, 128)

    wih_p = jnp.zeros((Ip, 3 * Hp), jnp.float32)
    whh_p = jnp.zeros((Hp, 3 * Hp), jnp.float32)
    for g in range(3):   # gate order [r, z, n], each gate starts on a 128-lane boundary
        wih_p = wih_p.at[:I, g * Hp:g * Hp + H].set(raw["w_ih"][g * H:(g + 1) * H, :].T)
        whh_p = whh_p.at[:H, g * Hp:g * Hp + H].set(raw["w_hh"][g * H:(g + 1) * H, :].T)

    bih_eff = jnp.zeros((1, 3 * Hp), jnp.float32)
    bih_eff = bih_eff.at[0, 0:H].set(raw["b_ih"][0:H] + raw["b_hh"][0:H])                # r
    bih_eff = bih_eff.at[0, Hp:Hp + H].set(raw["b_ih"][H:2 * H] + raw["b_hh"][H:2 * H])  # z
    bih_eff = bih_eff.at[0, 2 * Hp:2 * Hp + H].set(raw["b_ih"][2 * H:3 * H])             # n (input part)
    bhn_p = jnp.zeros((1, Hp), jnp.float32).at[0, :H].set(raw["b_hh"][2 * H:3 * H])      # n (hidden part)

    wfc_p = jnp.zeros((Hp, Op), jnp.float32).at[:H, :O].set(raw["w_fc"].T)
    bfc_p = jnp.zeros((1, Op), jnp.float32).at[0, :O].set(raw["b_fc"])

    return dict(wih_p=wih_p, whh_p=whh_p, bih_eff=bih_eff, bhn_p=bhn_p,
                wfc_p=wfc_p, bfc_p=bfc_p, hidden_size=H, output_size=O)


def gru_net_reference(x, raw, hidden_size):
    """Pure-JAX reference with PyTorch GRU semantics, for correctness checking."""
    B, T, _ = x.shape
    H = hidden_size
    h = jnp.zeros((B, H), jnp.float32)
    for t in range(T):
        xt = x[:, t, :]
        gi = xt @ raw["w_ih"].T + raw["b_ih"]
        gh = h @ raw["w_hh"].T + raw["b_hh"]
        r = jax.nn.sigmoid(gi[:, :H] + gh[:, :H])
        z = jax.nn.sigmoid(gi[:, H:2 * H] + gh[:, H:2 * H])
        n = jnp.tanh(gi[:, 2 * H:] + r * gh[:, 2 * H:])
        h = (1.0 - z) * n + z * h
    return h @ raw["w_fc"].T + raw["b_fc"]


if __name__ == "__main__":
    hidden_size = 3
    input_size = 20
    output_size = 1
    B, T = 2, 5

    key = jax.random.PRNGKey(0)
    kx, kp = jax.random.split(key)
    x = jax.random.normal(kx, (B, T, input_size), dtype=jnp.float32)

    raw = init_params(kp, input_size, hidden_size, output_size)
    packed = pack_params(raw, input_size, hidden_size, output_size)

    out = gru_net_forward(x, packed)
    jax.block_until_ready(out)
    assert out.shape == (B, output_size), out.shape

    ref = gru_net_reference(x, raw, hidden_size)
    assert jnp.allclose(out, ref, atol=1e-4, rtol=1e-4), (out, ref)

    print("KERNEL_OK")
</pallas_src>

<mosaic_0001>
module attributes {stable_mosaic.version = 11 : i64} {
  func.func @gru_net_kernel(%arg0: i32, %arg1: memref<5x8x128xf32, #tpu.memory_space<vmem>>, %arg2: memref<128x384xf32, #tpu.memory_space<vmem>>, %arg3: memref<128x384xf32, #tpu.memory_space<vmem>>, %arg4: memref<1x384xf32, #tpu.memory_space<vmem>>, %arg5: memref<1x128xf32, #tpu.memory_space<vmem>>, %arg6: memref<128x128xf32, #tpu.memory_space<vmem>>, %arg7: memref<1x128xf32, #tpu.memory_space<vmem>>, %arg8: memref<8x128xf32, #tpu.memory_space<vmem>>) attributes {dimension_semantics = [#tpu.dimension_semantics<parallel>], iteration_bounds = array<i64: 1>, scalar_prefetch = 0 : i64, scratch_operands = 0 : i64, tpu.core_type = #tpu.core_type<tc>, window_params = [{transform_indices = @transform_0, window_bounds = array<i64: 5, 8, 128>}, {pipeline_mode = #tpu.pipeline_mode<synchronous>, transform_indices = @transform_1, window_bounds = array<i64: 128, 384>}, {pipeline_mode = #tpu.pipeline_mode<synchronous>, transform_indices = @transform_2, window_bounds = array<i64: 128, 384>}, {pipeline_mode = #tpu.pipeline_mode<synchronous>, transform_indices = @transform_3, window_bounds = array<i64: 1, 384>}, {pipeline_mode = #tpu.pipeline_mode<synchronous>, transform_indices = @transform_4, window_bounds = array<i64: 1, 128>}, {pipeline_mode = #tpu.pipeline_mode<synchronous>, transform_indices = @transform_5, window_bounds = array<i64: 128, 128>}, {pipeline_mode = #tpu.pipeline_mode<synchronous>, transform_indices = @transform_6, window_bounds = array<i64: 1, 128>}, {transform_indices = @transform_7, window_bounds = array<i64: 8, 128>}]} {
    %c0 = arith.constant 0 : index
    %c0_0 = arith.constant 0 : index
    %c0_1 = arith.constant 0 : index
    %0 = vector.load %arg1[%c0, %c0_0, %c0_1] : memref<5x8x128xf32, #tpu.memory_space<vmem>>, vector<5x8x128xf32>
    %1 = vector.shape_cast %0 : vector<5x8x128xf32> to vector<40x128xf32>
    %c0_2 = arith.constant 0 : index
    %c0_3 = arith.constant 0 : index
    %2 = vector.load %arg2[%c0_2, %c0_3] : memref<128x384xf32, #tpu.memory_space<vmem>>, vector<128x384xf32>
    %cst = arith.constant dense<0.000000e+00> : vector<40x384xf32>
    %3 = tpu.matmul %1, %2, %cst {dimension_numbers = #tpu.dot_dimension_numbers<[1], [0], [0], [1], [0, 0, 1, 1], [], []>} : vector<40x128xf32>, vector<128x384xf32>, vector<40x384xf32> -> vector<40x384xf32>
    %c0_4 = arith.constant 0 : index
    %c0_5 = arith.constant 0 : index
    %4 = vector.load %arg4[%c0_4, %c0_5] : memref<1x384xf32, #tpu.memory_space<vmem>>, vector<1x384xf32>
    %5 = vector.broadcast %4 : vector<1x384xf32> to vector<40x384xf32>
    %6 = arith.addf %3, %5 : vector<40x384xf32>
    %c0_6 = arith.constant 0 : index
    %c0_7 = arith.constant 0 : index
    %7 = vector.load %arg3[%c0_6, %c0_7] : memref<128x384xf32, #tpu.memory_space<vmem>>, vector<128x384xf32>
    %c0_8 = arith.constant 0 : index
    %c0_9 = arith.constant 0 : index
    %8 = vector.load %arg5[%c0_8, %c0_9] : memref<1x128xf32, #tpu.memory_space<vmem>>, vector<1x128xf32>
    %9 = vector.shape_cast %8 : vector<1x128xf32> to vector<1x128xf32>
    %10 = vector.broadcast %9 : vector<1x128xf32> to vector<8x128xf32>
    %cst_10 = arith.constant 0.000000e+00 : f32
    %11 = vector.broadcast %cst_10 : f32 to vector<8x128xf32>
    %12 = vector.extract_strided_slice %6 {offsets = [0, 0], sizes = [8, 384], strides = [1, 1]} : vector<40x384xf32> to vector<8x384xf32>
    %cst_11 = arith.constant dense<0.000000e+00> : vector<8x384xf32>
    %13 = tpu.matmul %11, %7, %cst_11 {dimension_numbers = #tpu.dot_dimension_numbers<[1], [0], [0], [1], [0, 0, 1, 1], [], []>} : vector<8x128xf32>, vector<128x384xf32>, vector<8x384xf32> -> vector<8x384xf32>
    %14 = vector.extract_strided_slice %12 {offsets = [0, 0], sizes = [8, 128], strides = [1, 1]} : vector<8x384xf32> to vector<8x128xf32>
    %15 = vector.extract_strided_slice %13 {offsets = [0, 0], sizes = [8, 128], strides = [1, 1]} : vector<8x384xf32> to vector<8x128xf32>
    %16 = arith.addf %14, %15 : vector<8x128xf32>
    %17 = arith.negf %16 : vector<8x128xf32>
    %18 = math.exp %17 : vector<8x128xf32>
    %cst_12 = arith.constant 1.000000e+00 : f32
    %19 = vector.broadcast %cst_12 : f32 to vector<8x128xf32>
    %20 = arith.addf %19, %18 : vector<8x128xf32>
    %21 = arith.divf %19, %20 : vector<8x128xf32>
    %22 = vector.extract_strided_slice %12 {offsets = [0, 128], sizes = [8, 128], strides = [1, 1]} : vector<8x384xf32> to vector<8x128xf32>
    %23 = vector.extract_strided_slice %13 {offsets = [0, 128], sizes = [8, 128], strides = [1, 1]} : vector<8x384xf32> to vector<8x128xf32>
    %24 = arith.addf %22, %23 : vector<8x128xf32>
    %25 = arith.negf %24 : vector<8x128xf32>
    %26 = math.exp %25 : vector<8x128xf32>
    %cst_13 = arith.constant 1.000000e+00 : f32
    %27 = vector.broadcast %cst_13 : f32 to vector<8x128xf32>
    %28 = arith.addf %27, %26 : vector<8x128xf32>
    %29 = arith.divf %27, %28 : vector<8x128xf32>
    %30 = vector.extract_strided_slice %12 {offsets = [0, 256], sizes = [8, 128], strides = [1, 1]} : vector<8x384xf32> to vector<8x128xf32>
    %31 = vector.extract_strided_slice %13 {offsets = [0, 256], sizes = [8, 128], strides = [1, 1]} : vector<8x384xf32> to vector<8x128xf32>
    %32 = arith.addf %31, %10 : vector<8x128xf32>
    %33 = arith.mulf %21, %32 : vector<8x128xf32>
    %34 = arith.addf %30, %33 : vector<8x128xf32>
    %35 = math.tanh %34 : vector<8x128xf32>
    %cst_14 = arith.constant 1.000000e+00 : f32
    %36 = vector.broadcast %cst_14 : f32 to vector<8x128xf32>
    %37 = arith.subf %36, %29 : vector<8x128xf32>
    %38 = arith.mulf %37, %35 : vector<8x128xf32>
    %39 = arith.mulf %29, %11 : vector<8x128xf32>
    %40 = arith.addf %38, %39 : vector<8x128xf32>
    %41 = vector.extract_strided_slice %6 {offsets = [8, 0], sizes = [8, 384], strides = [1, 1]} : vector<40x384xf32> to vector<8x384xf32>
    %cst_15 = arith.constant dense<0.000000e+00> : vector<8x384xf32>
    %42 = tpu.matmul %40, %7, %cst_15 {dimension_numbers = #tpu.dot_dimension_numbers<[1], [0], [0], [1], [0, 0, 1, 1], [], []>} : vector<8x128xf32>, vector<128x384xf32>, vector<8x384xf32> -> vector<8x384xf32>
    %43 = vector.extract_strided_slice %41 {offsets = [0, 0], sizes = [8, 128], strides = [1, 1]} : vector<8x384xf32> to vector<8x128xf32>
    %44 = vector.extract_strided_slice %42 {offsets = [0, 0], sizes = [8, 128], strides = [1, 1]} : vector<8x384xf32> to vector<8x128xf32>
    %45 = arith.addf %43, %44 : vector<8x128xf32>
    %46 = arith.negf %45 : vector<8x128xf32>
    %47 = math.exp %46 : vector<8x128xf32>
    %cst_16 = arith.constant 1.000000e+00 : f32
    %48 = vector.broadcast %cst_16 : f32 to vector<8x128xf32>
    %49 = arith.addf %48, %47 : vector<8x128xf32>
    %50 = arith.divf %48, %49 : vector<8x128xf32>
    %51 = vector.extract_strided_slice %41 {offsets = [0, 128], sizes = [8, 128], strides = [1, 1]} : vector<8x384xf32> to vector<8x128xf32>
    %52 = vector.extract_strided_slice %42 {offsets = [0, 128], sizes = [8, 128], strides = [1, 1]} : vector<8x384xf32> to vector<8x128xf32>
    %53 = arith.addf %51, %52 : vector<8x128xf32>
    %54 = arith.negf %53 : vector<8x128xf32>
    %55 = math.exp %54 : vector<8x128xf32>
    %cst_17 = arith.constant 1.000000e+00 : f32
    %56 = vector.broadcast %cst_17 : f32 to vector<8x128xf32>
    %57 = arith.addf %56, %55 : vector<8x128xf32>
    %58 = arith.divf %56, %57 : vector<8x128xf32>
    %59 = vector.extract_strided_slice %41 {offsets = [0, 256], sizes = [8, 128], strides = [1, 1]} : vector<8x384xf32> to vector<8x128xf32>
    %60 = vector.extract_strided_slice %42 {offsets = [0, 256], sizes = [8, 128], strides = [1, 1]} : vector<8x384xf32> to vector<8x128xf32>
    %61 = arith.addf %60, %10 : vector<8x128xf32>
    %62 = arith.mulf %50, %61 : vector<8x128xf32>
    %63 = arith.addf %59, %62 : vector<8x128xf32>
    %64 = math.tanh %63 : vector<8x128xf32>
    %cst_18 = arith.constant 1.000000e+00 : f32
    %65 = vector.broadcast %cst_18 : f32 to vector<8x128xf32>
    %66 = arith.subf %65, %58 : vector<8x128xf32>
    %67 = arith.mulf %66, %64 : vector<8x128xf32>
    %68 = arith.mulf %58, %40 : vector<8x128xf32>
    %69 = arith.addf %67, %68 : vector<8x128xf32>
    %70 = vector.extract_strided_slice %6 {offsets = [16, 0], sizes = [8, 384], strides = [1, 1]} : vector<40x384xf32> to vector<8x384xf32>
    %cst_19 = arith.constant dense<0.000000e+00> : vector<8x384xf32>
    %71 = tpu.matmul %69, %7, %cst_19 {dimension_numbers = #tpu.dot_dimension_numbers<[1], [0], [0], [1], [0, 0, 1, 1], [], []>} : vector<8x128xf32>, vector<128x384xf32>, vector<8x384xf32> -> vector<8x384xf32>
    %72 = vector.extract_strided_slice %70 {offsets = [0, 0], sizes = [8, 128], strides = [1, 1]} : vector<8x384xf32> to vector<8x128xf32>
    %73 = vector.extract_strided_slice %71 {offsets = [0, 0], sizes = [8, 128], strides = [1, 1]} : vector<8x384xf32> to vector<8x128xf32>
    %74 = arith.addf %72, %73 : vector<8x128xf32>
    %75 = arith.negf %74 : vector<8x128xf32>
    %76 = math.exp %75 : vector<8x128xf32>
    %cst_20 = arith.constant 1.000000e+00 : f32
    %77 = vector.broadcast %cst_20 : f32 to vector<8x128xf32>
    %78 = arith.addf %77, %76 : vector<8x128xf32>
    %79 = arith.divf %77, %78 : vector<8x128xf32>
    %80 = vector.extract_strided_slice %70 {offsets = [0, 128], sizes = [8, 128], strides = [1, 1]} : vector<8x384xf32> to vector<8x128xf32>
    %81 = vector.extract_strided_slice %71 {offsets = [0, 128], sizes = [8, 128], strides = [1, 1]} : vector<8x384xf32> to vector<8x128xf32>
    %82 = arith.addf %80, %81 : vector<8x128xf32>
    %83 = arith.negf %82 : vector<8x128xf32>
    %84 = math.exp %83 : vector<8x128xf32>
    %cst_21 = arith.constant 1.000000e+00 : f32
    %85 = vector.broadcast %cst_21 : f32 to vector<8x128xf32>
    %86 = arith.addf %85, %84 : vector<8x128xf32>
    %87 = arith.divf %85, %86 : vector<8x128xf32>
    %88 = vector.extract_strided_slice %70 {offsets = [0, 256], sizes = [8, 128], strides = [1, 1]} : vector<8x384xf32> to vector<8x128xf32>
    %89 = vector.extract_strided_slice %71 {offsets = [0, 256], sizes = [8, 128], strides = [1, 1]} : vector<8x384xf32> to vector<8x128xf32>
    %90 = arith.addf %89, %10 : vector<8x128xf32>
    %91 = arith.mulf %79, %90 : vector<8x128xf32>
    %92 = arith.addf %88, %91 : vector<8x128xf32>
    %93 = math.tanh %92 : vector<8x128xf32>
    %cst_22 = arith.constant 1.000000e+00 : f32
    %94 = vector.broadcast %cst_22 : f32 to vector<8x128xf32>
    %95 = arith.subf %94, %87 : vector<8x128xf32>
    %96 = arith.mulf %95, %93 : vector<8x128xf32>
    %97 = arith.mulf %87, %69 : vector<8x128xf32>
    %98 = arith.addf %96, %97 : vector<8x128xf32>
    %99 = vector.extract_strided_slice %6 {offsets = [24, 0], sizes = [8, 384], strides = [1, 1]} : vector<40x384xf32> to vector<8x384xf32>
    %cst_23 = arith.constant dense<0.000000e+00> : vector<8x384xf32>
    %100 = tpu.matmul %98, %7, %cst_23 {dimension_numbers = #tpu.dot_dimension_numbers<[1], [0], [0], [1], [0, 0, 1, 1], [], []>} : vector<8x128xf32>, vector<128x384xf32>, vector<8x384xf32> -> vector<8x384xf32>
    %101 = vector.extract_strided_slice %99 {offsets = [0, 0], sizes = [8, 128], strides = [1, 1]} : vector<8x384xf32> to vector<8x128xf32>
    %102 = vector.extract_strided_slice %100 {offsets = [0, 0], sizes = [8, 128], strides = [1, 1]} : vector<8x384xf32> to vector<8x128xf32>
    %103 = arith.addf %101, %102 : vector<8x128xf32>
    %104 = arith.negf %103 : vector<8x128xf32>
    %105 = math.exp %104 : vector<8x128xf32>
    %cst_24 = arith.constant 1.000000e+00 : f32
    %106 = vector.broadcast %cst_24 : f32 to vector<8x128xf32>
    %107 = arith.addf %106, %105 : vector<8x128xf32>
    %108 = arith.divf %106, %107 : vector<8x128xf32>
    %109 = vector.extract_strided_slice %99 {offsets = [0, 128], sizes = [8, 128], strides = [1, 1]} : vector<8x384xf32> to vector<8x128xf32>
    %110 = vector.extract_strided_slice %100 {offsets = [0, 128], sizes = [8, 128], strides = [1, 1]} : vector<8x384xf32> to vector<8x128xf32>
    %111 = arith.addf %109, %110 : vector<8x128xf32>
    %112 = arith.negf %111 : vector<8x128xf32>
    %113 = math.exp %112 : vector<8x128xf32>
    %cst_25 = arith.constant 1.000000e+00 : f32
    %114 = vector.broadcast %cst_25 : f32 to vector<8x128xf32>
    %115 = arith.addf %114, %113 : vector<8x128xf32>
    %116 = arith.divf %114, %115 : vector<8x128xf32>
    %117 = vector.extract_strided_slice %99 {offsets = [0, 256], sizes = [8, 128], strides = [1, 1]} : vector<8x384xf32> to vector<8x128xf32>
    %118 = vector.extract_strided_slice %100 {offsets = [0, 256], sizes = [8, 128], strides = [1, 1]} : vector<8x384xf32> to vector<8x128xf32>
    %119 = arith.addf %118, %10 : vector<8x128xf32>
    %120 = arith.mulf %108, %119 : vector<8x128xf32>
    %121 = arith.addf %117, %120 : vector<8x128xf32>
    %122 = math.tanh %121 : vector<8x128xf32>
    %cst_26 = arith.constant 1.000000e+00 : f32
    %123 = vector.broadcast %cst_26 : f32 to vector<8x128xf32>
    %124 = arith.subf %123, %116 : vector<8x128xf32>
    %125 = arith.mulf %124, %122 : vector<8x128xf32>
    %126 = arith.mulf %116, %98 : vector<8x128xf32>
    %127 = arith.addf %125, %126 : vector<8x128xf32>
    %128 = vector.extract_strided_slice %6 {offsets = [32, 0], sizes = [8, 384], strides = [1, 1]} : vector<40x384xf32> to vector<8x384xf32>
    %cst_27 = arith.constant dense<0.000000e+00> : vector<8x384xf32>
    %129 = tpu.matmul %127, %7, %cst_27 {dimension_numbers = #tpu.dot_dimension_numbers<[1], [0], [0], [1], [0, 0, 1, 1], [], []>} : vector<8x128xf32>, vector<128x384xf32>, vector<8x384xf32> -> vector<8x384xf32>
    %130 = vector.extract_strided_slice %128 {offsets = [0, 0], sizes = [8, 128], strides = [1, 1]} : vector<8x384xf32> to vector<8x128xf32>
    %131 = vector.extract_strided_slice %129 {offsets = [0, 0], sizes = [8, 128], strides = [1, 1]} : vector<8x384xf32> to vector<8x128xf32>
    %132 = arith.addf %130, %131 : vector<8x128xf32>
    %133 = arith.negf %132 : vector<8x128xf32>
    %134 = math.exp %133 : vector<8x128xf32>
    %cst_28 = arith.constant 1.000000e+00 : f32
    %135 = vector.broadcast %cst_28 : f32 to vector<8x128xf32>
    %136 = arith.addf %135, %134 : vector<8x128xf32>
    %137 = arith.divf %135, %136 : vector<8x128xf32>
    %138 = vector.extract_strided_slice %128 {offsets = [0, 128], sizes = [8, 128], strides = [1, 1]} : vector<8x384xf32> to vector<8x128xf32>
    %139 = vector.extract_strided_slice %129 {offsets = [0, 128], sizes = [8, 128], strides = [1, 1]} : vector<8x384xf32> to vector<8x128xf32>
    %140 = arith.addf %138, %139 : vector<8x128xf32>
    %141 = arith.negf %140 : vector<8x128xf32>
    %142 = math.exp %141 : vector<8x128xf32>
    %cst_29 = arith.constant 1.000000e+00 : f32
    %143 = vector.broadcast %cst_29 : f32 to vector<8x128xf32>
    %144 = arith.addf %143, %142 : vector<8x128xf32>
    %145 = arith.divf %143, %144 : vector<8x128xf32>
    %146 = vector.extract_strided_slice %128 {offsets = [0, 256], sizes = [8, 128], strides = [1, 1]} : vector<8x384xf32> to vector<8x128xf32>
    %147 = vector.extract_strided_slice %129 {offsets = [0, 256], sizes = [8, 128], strides = [1, 1]} : vector<8x384xf32> to vector<8x128xf32>
    %148 = arith.addf %147, %10 : vector<8x128xf32>
    %149 = arith.mulf %137, %148 : vector<8x128xf32>
    %150 = arith.addf %146, %149 : vector<8x128xf32>
    %151 = math.tanh %150 : vector<8x128xf32>
    %cst_30 = arith.constant 1.000000e+00 : f32
    %152 = vector.broadcast %cst_30 : f32 to vector<8x128xf32>
    %153 = arith.subf %152, %145 : vector<8x128xf32>
    %154 = arith.mulf %153, %151 : vector<8x128xf32>
    %155 = arith.mulf %145, %127 : vector<8x128xf32>
    %156 = arith.addf %154, %155 : vector<8x128xf32>
    %c0_31 = arith.constant 0 : index
    %c0_32 = arith.constant 0 : index
    %157 = vector.load %arg6[%c0_31, %c0_32] : memref<128x128xf32, #tpu.memory_space<vmem>>, vector<128x128xf32>
    %cst_33 = arith.constant dense<0.000000e+00> : vector<8x128xf32>
    %158 = tpu.matmul %156, %157, %cst_33 {dimension_numbers = #tpu.dot_dimension_numbers<[1], [0], [0], [1], [0, 0, 1, 1], [], []>} : vector<8x128xf32>, vector<128x128xf32>, vector<8x128xf32> -> vector<8x128xf32>
    %c0_34 = arith.constant 0 : index
    %c0_35 = arith.constant 0 : index
    %159 = vector.load %arg7[%c0_34, %c0_35] : memref<1x128xf32, #tpu.memory_space<vmem>>, vector<1x128xf32>
    %160 = vector.broadcast %159 : vector<1x128xf32> to vector<8x128xf32>
    %161 = arith.addf %158, %160 : vector<8x128xf32>
    %c0_36 = arith.constant 0 : index
    %c0_37 = arith.constant 0 : index
    %162 = vector.load %arg8[%c0_36, %c0_37] : memref<8x128xf32, #tpu.memory_space<vmem>>, vector<8x128xf32>
    tpu.vector_store %arg8[%c0_36, %c0_37], %161 {strides = array<i32>} : memref<8x128xf32, #tpu.memory_space<vmem>>, vector<8x128xf32>,
    return
  }
  func.func @transform_0(%arg0: i32) -> (i32, i32, i32) {
    %c0_i32 = arith.constant 0 : i32
    %c0_i32_0 = arith.constant 0 : i32
    %c0_i32_1 = arith.constant 0 : i32
    return %c0_i32, %arg0, %c0_i32_0 : i32, i32, i32
  }
  func.func @transform_1(%arg0: i32) -> (i32, i32) {
    %c0_i32 = arith.constant 0 : i32
    %c0_i32_0 = arith.constant 0 : i32
    %c0_i32_1 = arith.constant 0 : i32
    return %c0_i32, %c0_i32_0 : i32, i32
  }
  func.func @transform_2(%arg0: i32) -> (i32, i32) {
    %c0_i32 = arith.constant 0 : i32
    %c0_i32_0 = arith.constant 0 : i32
    %c0_i32_1 = arith.constant 0 : i32
    return %c0_i32, %c0_i32_0 : i32, i32
  }
  func.func @transform_3(%arg0: i32) -> (i32, i32) {
    %c0_i32 = arith.constant 0 : i32
    %c0_i32_0 = arith.constant 0 : i32
    %c0_i32_1 = arith.constant 0 : i32
    return %c0_i32, %c0_i32_0 : i32, i32
  }
  func.func @transform_4(%arg0: i32) -> (i32, i32) {
    %c0_i32 = arith.constant 0 : i32
    %c0_i32_0 = arith.constant 0 : i32
    %c0_i32_1 = arith.constant 0 : i32
    return %c0_i32, %c0_i32_0 : i32, i32
  }
  func.func @transform_5(%arg0: i32) -> (i32, i32) {
    %c0_i32 = arith.constant 0 : i32
    %c0_i32_0 = arith.constant 0 : i32
    %c0_i32_1 = arith.constant 0 : i32
    return %c0_i32, %c0_i32_0 : i32, i32
  }
  func.func @transform_6(%arg0: i32) -> (i32, i32) {
    %c0_i32 = arith.constant 0 : i32
    %c0_i32_0 = arith.constant 0 : i32
    %c0_i32_1 = arith.constant 0 : i32
    return %c0_i32, %c0_i32_0 : i32, i32
  }
  func.func @transform_7(%arg0: i32) -> (i32, i32) {
    %c0_i32 = arith.constant 0 : i32
    %c0_i32_0 = arith.constant 0 : i32
    return %arg0, %c0_i32 : i32, i32
  }
}

</mosaic_0001>

<bundles_post_ra>
// kernel: tpu_custom_call.1
= control target key start
LH: loop header
LB: loop body
LE: loop exit
PB: predicated region body
PF: predicated region fallthrough
CT: control target
= control target key end

     0   :  { %12 = vsyncpa [#allocation3], 0  ;;  %s2706_s0 = inlined_call_operand.hbm [shape: f32[5,8,128], index: 0, kind: input, shape index: {}]   ;;  %s2707_s1 = inlined_call_operand.hbm [shape: f32[128,384], index: 1, kind: input, shape index: {}]   ;;  %s2708_s2 = inlined_call_operand.hbm [shape: f32[128,384], index: 2, kind: input, shape index: {}]   ;;  %s2709_s3 = inlined_call_operand.vmem [shape: f32[1,384], index: 3, kind: input, shape index: {}]   ;;  %s2710_s4 = inlined_call_operand.vmem [shape: f32[1,128], index: 4, kind: input, shape index: {}]   ;;  %s2711_s5 = inlined_call_operand.hbm [shape: f32[128,128], index: 5, kind: input, shape index: {}]   ;;  %s2712_s6 = inlined_call_operand.vmem [shape: f32[1,128], index: 6, kind: input, shape index: {}]   ;;  %s2713_s7 = inlined_call_operand.hbm [shape: f32[8,128], index: 7, kind: output, shape index: {}]  }
   0x1   :  { %13 = vsyncpa [#allocation6], 0 }
   0x2   :  { %14 = vsyncpa [#allocation9], 0 }
   0x3   :  { %15 = vsyncpa [#allocation4], 0  ;;  %s2270_s24 = smov [#allocation5]   ;;  %s2152_s28 = scalar_lea.hbm %s2707_s1, 6144 }
   0x4   :  { %s33_s25 = sshll.u32 %s2270_s24, 4  ;;  %p2153_p0 = scmp.ne.s32.totalorder %s2707_s1, %s2152_s28  ;;  %s34_s25 = int_to_ptr.vmem [resolvable:$true] %s33_s25 }
   0x5   :  { %p2156_p1 = scmp.lt.u32.totalorder %s2152_s28, %s2707_s1 }
   0x7   :  { %p2158_p2 = pnand %p2156_p1, %p2153_p0 }
   0x9   :  { %2161 = shalt.err (!%p2158_p2)
}
   0xa   :  { %s2162_s10 = scalar_lea.vmem %s34_s25, 6144  ;;  %p2167_p4 = scmp.lt.s32.totalorder %s34_s25, %s34_s25 }
   0xb   :  { %p2163_p3 = scmp.ne.s32.totalorder %s34_s25, %s2162_s10  ;;  %p2168_p5 = scmp.lt.s32.totalorder %s2162_s10, %s2162_s10 }
   0xd   :  { %p2169_p6 = por %p2168_p5, %p2167_p4 }
   0xf   :  { %p2170_p7 = pnand %p2169_p6, %p2163_p3 }
  0x11   :  { %2173 = shalt.err (!%p2170_p7)
}
  0x12   :  { %s2271_s11 = smov 384   ;;  %s2272_s12 = smov 24  }
  0x13   :  { %39 = dma.hbm_to_vmem [thread:$0]  %s2707_s1, 6144, %s34_s25, [#allocation6], %s2271_s11, %s2271_s11, %s2272_s12  }
  0x14   :  { %s2273_s15 = smov [#allocation2]   ;;  %s2174_s19 = scalar_lea.hbm %s2706_s0, 640 }
  0x15   :  { %s21_s16 = sshll.u32 %s2273_s15, 4  ;;  %p2175_p8 = scmp.ne.s32.totalorder %s2706_s0, %s2174_s19  ;;  %s22_s16 = int_to_ptr.vmem [resolvable:$true] %s21_s16 }
  0x16   :  { %p2178_p9 = scmp.lt.u32.totalorder %s2174_s19, %s2706_s0 }
  0x18   :  { %p2180_p10 = pnand %p2178_p9, %p2175_p8 }
  0x1a   :  { %2183 = shalt.err (!%p2180_p10)
}
  0x1b   :  { %s2184_s24 = scalar_lea.vmem %s22_s16, 640  ;;  %p2189_p12 = scmp.lt.s32.totalorder %s22_s16, %s22_s16 }
  0x1c   :  { %p2185_p11 = scmp.ne.s32.totalorder %s22_s16, %s2184_s24  ;;  %p2190_p13 = scmp.lt.s32.totalorder %s2184_s24, %s2184_s24 }
  0x1e   :  { %p2191_p0 = por %p2190_p13, %p2189_p12 }
  0x20   :  { %p2192_p1 = pnand %p2191_p0, %p2185_p11 }
  0x22   :  { %2195 = shalt.err (!%p2192_p1)
}
  0x23   :  { %s2274_s1 = smov 128   ;;  %s2275_s25 = smov 8  }
  0x24   :  { %27 = dma.hbm_to_vmem [thread:$0]  %s2706_s0, 640, %s22_s16, [#allocation3], %s2274_s1, %s2274_s1, %s2275_s25  }
  0x25   :  { %s2276_s28 = smov [#allocation7]   ;;  %s2277_s30 = smov [#allocation8]  }
  0x26   :  { %s45_s29 = sshll.u32 %s2276_s28, 4  ;;  %s61_s8 = sshll.u32 %s2277_s30, 4  ;;  %s46_s29 = int_to_ptr.vmem [resolvable:$true] %s45_s29  ;;  %s2352_s8 = int_to_ptr.vmem [resolvable:$true] %s61_s8 }
  0x27   :  { %s2196_s13 = scalar_lea.hbm %s2708_s2, 6144 }
  0x28   :  { %p2197_p2 = scmp.ne.s32.totalorder %s2708_s2, %s2196_s13  ;;  %p2200_p3 = scmp.lt.u32.totalorder %s2196_s13, %s2708_s2 }
  0x2a   :  { %p2202_p4 = pnand %p2200_p3, %p2197_p2 }
  0x2c   :  { %2205 = shalt.err (!%p2202_p4)
}
  0x2d   :  { %s2206_s0 = scalar_lea.vmem %s46_s29, 6144  ;;  %p2211_p6 = scmp.lt.s32.totalorder %s46_s29, %s46_s29 }
  0x2e   :  { %p2207_p5 = scmp.ne.s32.totalorder %s46_s29, %s2206_s0  ;;  %p2212_p7 = scmp.lt.s32.totalorder %s2206_s0, %s2206_s0 }
  0x30   :  { %p2213_p8 = por %p2212_p7, %p2211_p6 }
  0x32   :  { %p2214_p9 = pnand %p2213_p8, %p2207_p5 }
  0x34   :  { %2217 = shalt.err (!%p2214_p9)
}
  0x35   :  { %51 = dma.hbm_to_vmem [thread:$0]  %s2708_s2, 6144, %s46_s29, [#allocation6], %s2271_s11, %s2271_s11, %s2272_s12  }
  0x36   :  { %s2218_s22 = scalar_lea.hbm %s2711_s5, 2048 }
  0x37   :  { %p2219_p10 = scmp.ne.s32.totalorder %s2711_s5, %s2218_s22  ;;  %p2222_p11 = scmp.lt.u32.totalorder %s2218_s22, %s2711_s5 }
  0x39   :  { %p2224_p12 = pnand %p2222_p11, %p2219_p10 }
  0x3b   :  { %2227 = shalt.err (!%p2224_p12)
}
  0x3c   :  { %s2228_s28 = scalar_lea.vmem %s2352_s8, 2048  ;;  %p2233_p0 = scmp.lt.s32.totalorder %s2352_s8, %s2352_s8 }
  0x3d   :  { %p2229_p13 = scmp.ne.s32.totalorder %s2352_s8, %s2228_s28  ;;  %p2234_p1 = scmp.lt.s32.totalorder %s2228_s28, %s2228_s28 }
  0x3f   :  { %p2235_p2 = por %p2234_p1, %p2233_p0 }
  0x41   :  { %p2236_p3 = pnand %p2235_p2, %p2229_p13 }
  0x43   :  { %2239 = shalt.err (!%p2236_p3)
}
  0x44   :  { %67 = dma.hbm_to_vmem [thread:$0]  %s2711_s5, 2048, %s2352_s8, [#allocation9], %s2274_s1, %s2274_s1, %s2275_s25  }
  0x45   :  { %2262 = dma.done.wait [#allocation3], 640  }
  0x46   :  { %2263 = vsyncadd [#allocation3], 4294966656 }
  0x47   :  { %2264 = dma.done.wait [#allocation6], 12288  }
  0x48   :  { %2265 = vsyncadd [#allocation6], 4294955008 }
  0x49   :  { %2266 = dma.done.wait [#allocation9], 2048  }
  0x4a   :  { %2267 = vsyncadd [#allocation9], 4294965248  ;;  %v2278_v0 = vmov 0.0|0.0   ;;  %v2279_v1 = vmov 0.0   ;;  %vm2280_vm0 = vmmov 0   ;;  %v88_v2 = vld [vmem:[#allocation5 + $0x8] sm:$0xff] }
  0x4b   :  { %1742 = vmatprep.subr.bf16.mxu1 %v2278_v0  ;;  %216 = vmatprep.mubr.f32.mxu0 %v2279_v1  ;;  %v91_v3 = vld [vmem:[#allocation5 + $0x20] sm:$0xff]  ;;  %v90_v6 = vld [vmem:[#allocation5 + $0x18] sm:$0xff]  ;;  %v97_v8 = vld [vmem:[#allocation5 + $0x50] sm:$0xff]  ;;  %s2281_s29 = smov [#allocation10]  }
  0x4c   :  { %1485 = vmatprep.mubr.msk.f32.mxu1 %vm2280_vm0, %v2279_v1  ;;  %v87_v4 = vld [vmem:[#allocation5] sm:$0xff]  ;;  %v1710_v5 = vpack.c.bf16 %v91_v3, %v88_v2  ;;  %v94_v7 = vld [vmem:[#allocation5 + $0x38] sm:$0xff]  ;;  %v93_v11 = vld [vmem:[#allocation5 + $0x30] sm:$0xff]  ;;  %s1307_s30 = sshll.u32 %s2281_s29, 4  ;;  %s1308_s30 = int_to_ptr.vmem [resolvable:$true] %s1307_s30 }
  0x4d   :  { %v1712_v9 = vpack.c.bf16 %v90_v6, %v87_v4  ;;  %v1714_v10 = vpack.c.bf16 %v97_v8, %v94_v7  ;;  %v96_v12 = vld [vmem:[#allocation5 + $0x48] sm:$0xff]  ;;  %v103_v14 = vld [vmem:[#allocation5 + $0x80] sm:$0xff]  ;;  %v102_v18 = vld [vmem:[#allocation5 + $0x78] sm:$0xff]  ;;  %s2240_s8 = scalar_lea.vmem %s1308_s30, 128  ;;  %p2245_p5 = scmp.lt.s32.totalorder %s1308_s30, %s1308_s30 }
  0x4e   :  { %v100_v13 = vld [vmem:[#allocation5 + $0x68] sm:$0xff]  ;;  %1711 = vmatprep.subr.bf16.mxu0 %v1710_v5  ;;  %v1716_v15 = vpack.c.bf16 %v96_v12, %v93_v11  ;;  %v99_v17 = vld [vmem:[#allocation5 + $0x60] sm:$0xff]  ;;  %v106_v19 = vld [vmem:[#allocation5 + $0x98] sm:$0xff]  ;;  %p2241_p4 = scmp.ne.s32.totalorder %s1308_s30, %s2240_s8  ;;  %p2246_p6 = scmp.lt.s32.totalorder %s2240_s8, %s2240_s8 }
  0x4f   :  { %1713 = vmatpush1.bf16.msra.mxu0 %v1712_v9  ;;  %v1718_v16 = vpack.c.bf16 %v103_v14, %v100_v13  ;;  %v109_v20 = vld [vmem:[#allocation5 + $0xb0] sm:$0xff]  ;;  %v1720_v21 = vpack.c.bf16 %v102_v18, %v99_v17  ;;  %v108_v24 = vld [vmem:[#allocation5 + $0xa8] sm:$0xff]  ;;  %v115_v28 = vld [vmem:[#allocation5 + $0xe0] sm:$0xff] }
  0x50   :  { %1715 = vmatprep.subr.bf16.mxu0 %v1714_v10  ;;  %v105_v22 = vld [vmem:[#allocation5 + $0x90] sm:$0xff]  ;;  %v1722_v23 = vpack.c.bf16 %v109_v20, %v106_v19  ;;  %v92_v26 = vld [vmem:[#allocation5 + $0x28] sm:$0xff]  ;;  %v95_v30 = vld [vmem:[#allocation5 + $0x40] sm:$0xff]  ;;  %p2247_p7 = por %p2246_p6, %p2245_p5 }
  0x51   :  { %v89_v25 = vld [vmem:[#allocation5 + $0x10] sm:$0xff]  ;;  %v112_v27 = vld [vmem:[#allocation5 + $0xc8] sm:$0xff]  ;;  %v98_v31 = vld [vmem:[#allocation5 + $0x58] sm:$0xff]  ;;  %v1724_v32 = vpack.c.bf16 %v108_v24, %v105_v22 }
  0x52   :  { %v1743_v29 = vpack.c.bf16 %v92_v26, %v89_v25  ;;  %v1746_v33 = vpack.c.bf16 %v98_v31, %v95_v30  ;;  %v1726_v34 = vpack.c.bf16 %v115_v28, %v112_v27  ;;  %v111_v35 = vld [vmem:[#allocation5 + $0xc0] sm:$0xff]  ;;  %v114_v36 = vld [vmem:[#allocation5 + $0xd8] sm:$0xff]  ;;  %v101_v37 = vld [vmem:[#allocation5 + $0x70] sm:$0xff]  ;;  %p2248_p8 = pnand %p2247_p7, %p2241_p4 }
  0x53   :  { %1717 = vmatpush1.bf16.msra.mxu0 %v1716_v15  ;;  %v118_v38 = vld [vmem:[#allocation5 + $0xf8] sm:$0xff]  ;;  %v121_v39 = vld [vmem:[#allocation5 + $0x110] sm:$0xff]  ;;  %v104_v40 = vld [vmem:[#allocation5 + $0x88] sm:$0xff]  ;;  %v1728_v41 = vpack.c.bf16 %v114_v36, %v111_v35 }
  0x54   :  { %1719 = vmatprep.subr.bf16.mxu0 %v1718_v16  ;;  %1744 = vmatpush3.bf16.msra.mxu1 %v1743_v29  ;;  %v117_v42 = vld [vmem:[#allocation5 + $0xf0] sm:$0xff]  ;;  %v1749_v43 = vpack.c.bf16 %v104_v40, %v101_v37  ;;  %v1730_v44 = vpack.c.bf16 %v121_v39, %v118_v38  ;;  %v120_v45 = vld [vmem:[#allocation5 + $0x108] sm:$0xff]  ;;  %v107_v46 = vld [vmem:[#allocation5 + $0xa0] sm:$0xff] }
  0x55   :  { %1745 = vmatprep.subr.bf16.mxu1 %v2278_v0  ;;  %v110_v47 = vld [vmem:[#allocation5 + $0xb8] sm:$0xff]  ;;  %v124_v48 = vld [vmem:[#allocation5 + $0x128] sm:$0xff]  ;;  %v127_v49 = vld [vmem:[#allocation5 + $0x140] sm:$0xff]  ;;  %v1732_v50 = vpack.c.bf16 %v120_v45, %v117_v42 }
  0x56   :  { %v123_v51 = vld [vmem:[#allocation5 + $0x120] sm:$0xff]  ;;  %v1752_v52 = vpack.c.bf16 %v110_v47, %v107_v46  ;;  %v1734_v53 = vpack.c.bf16 %v127_v49, %v124_v48  ;;  %v126_v54 = vld [vmem:[#allocation5 + $0x138] sm:$0xff]  ;;  %v113_v55 = vld [vmem:[#allocation5 + $0xd0] sm:$0xff] }
  0x57   :  { %1721 = vmatpush1.bf16.msra.mxu0 %v1720_v21  ;;  %v116_v56 = vld [vmem:[#allocation5 + $0xe8] sm:$0xff]  ;;  %v130_v57 = vld [vmem:[#allocation5 + $0x158] sm:$0xff]  ;;  %v133_v58 = vld [vmem:[#allocation5 + $0x170] sm:$0xff]  ;;  %v1736_v59 = vpack.c.bf16 %v126_v54, %v123_v51 }
  0x58   :  { %1723 = vmatprep.subr.bf16.mxu0 %v1722_v23  ;;  %1747 = vmatpush3.bf16.msra.mxu1 %v1746_v33  ;;  %v129_v60 = vld [vmem:[#allocation5 + $0x150] sm:$0xff]  ;;  %v1755_v61 = vpack.c.bf16 %v116_v56, %v113_v55  ;;  %v1738_v62 = vpack.c.bf16 %v133_v58, %v130_v57  ;;  %v132_v63 = vld [vmem:[#allocation5 + $0x168] sm:$0xff]  ;;  %v119_v2 = vld [vmem:[#allocation5 + $0x100] sm:$0xff] }
  0x59   :  { %1748 = vmatprep.subr.bf16.mxu1 %v2278_v0  ;;  %v122_v3 = vld [vmem:[#allocation5 + $0x118] sm:$0xff]  ;;  %v338_v4 = vld [vmem:[#allocation7 + $0x8] sm:$0xff]  ;;  %v341_v5 = vld [vmem:[#allocation7 + $0x20] sm:$0xff]  ;;  %v1740_v6 = vpack.c.bf16 %v132_v63, %v129_v60 }
  0x5a   :  { %v1758_v7 = vpack.c.bf16 %v122_v3, %v119_v2  ;;  %v2397_v8 = vpack.c.bf16 %v341_v5, %v338_v4  ;;  %v337_v9 = vld [vmem:[#allocation7] sm:$0xff]  ;;  %v340_v10 = vld [vmem:[#allocation7 + $0x18] sm:$0xff]  ;;  %v347_v12 = vld [vmem:[#allocation7 + $0x50] sm:$0xff] }
  0x5b   :  { %1725 = vmatpush1.bf16.msra.mxu0 %v1724_v32  ;;  %v344_v11 = vld [vmem:[#allocation7 + $0x38] sm:$0xff]  ;;  %v125_v13 = vld [vmem:[#allocation5 + $0x130] sm:$0xff]  ;;  %v128_v14 = vld [vmem:[#allocation5 + $0x148] sm:$0xff]  ;;  %v2400_v16 = vpack.c.bf16 %v340_v10, %v337_v9 }
  0x5c   :  { %1727 = vmatprep.subr.bf16.mxu0 %v1726_v34  ;;  %1750 = vmatpush3.bf16.msra.mxu1 %v1749_v43  ;;  %v82_v15 = vld [vmem:[#allocation2] sm:$0xff]  ;;  %v2403_v17 = vpack.c.bf16 %v347_v12, %v344_v11  ;;  %v343_v18 = vld [vmem:[#allocation7 + $0x30] sm:$0xff]  ;;  %v346_v19 = vld [vmem:[#allocation7 + $0x48] sm:$0xff]  ;;  %v1761_v21 = vpack.c.bf16 %v128_v14, %v125_v13 }
  0x5d   :  { %1751 = vmatprep.subr.bf16.mxu1 %v2278_v0  ;;  %v350_v20 = vld [vmem:[#allocation7 + $0x68] sm:$0xff]  ;;  %v353_v22 = vld [vmem:[#allocation7 + $0x80] sm:$0xff]  ;;  %v134_v24 = vld [vmem:[#allocation5 + $0x178] sm:$0xff]  ;;  %v2407_v25 = vpack.c.bf16 %v346_v19, %v343_v18 }
  0x5e   :  { %v131_v23 = vld [vmem:[#allocation5 + $0x160] sm:$0xff]  ;;  %v2411_v27 = vpack.c.bf16 %v353_v22, %v350_v20  ;;  %v352_v29 = vld [vmem:[#allocation7 + $0x78] sm:$0xff]  ;;  %v359_v32 = vld [vmem:[#allocation7 + $0xb0] sm:$0xff] }
  0x5f   :  { %1729 = vmatpush1.bf16.msra.mxu0 %v1728_v41  ;;  %v83_v26 = vld [vmem:[#allocation2 + $0x8] sm:$0xff]  ;;  %v1764_v30 = vpack.c.bf16 %v134_v24, %v131_v23  ;;  %v356_v31 = vld [vmem:[#allocation7 + $0x98] sm:$0xff]  ;;  %v339_v33 = vld [vmem:[#allocation7 + $0x10] sm:$0xff] }
  0x60   :  { %1731 = vmatprep.subr.bf16.mxu0 %v1730_v44  ;;  %1753 = vmatpush3.bf16.msra.mxu1 %v1752_v52  ;;  %v349_v28 = vld [vmem:[#allocation7 + $0x60] sm:$0xff]  ;;  %v342_v34 = vld [vmem:[#allocation7 + $0x28] sm:$0xff]  ;;  %v2419_v37 = vpack.c.bf16 %v359_v32, %v356_v31  ;;  %v355_v38 = vld [vmem:[#allocation7 + $0x90] sm:$0xff]  ;;  %v137_v32 = vlaneseq }
  0x61   :  { %1754 = vmatprep.subr.bf16.mxu1 %v2278_v0  ;;  %v2415_v35 = vpack.c.bf16 %v352_v29, %v349_v28  ;;  %v84_v36 = vld [vmem:[#allocation2 + $0x10] sm:$0xff]  ;;  %v365_v41 = vld [vmem:[#allocation7 + $0xe0] sm:$0xff]  ;;  %v2422_v42 = vpack.c.bf16 %v342_v34, %v339_v33  ;;  %v348_v44 = vld [vmem:[#allocation7 + $0x58] sm:$0xff] }
  0x62   :  { %v358_v39 = vld [vmem:[#allocation7 + $0xa8] sm:$0xff]  ;;  %v345_v43 = vld [vmem:[#allocation7 + $0x40] sm:$0xff]  ;;  %v85_v46 = vld [vmem:[#allocation2 + $0x18] sm:$0xff]  ;;  %v138_v33 = vshrl.u32 %v137_v32, 7 }
  0x63   :  { %1733 = vmatpush1.bf16.msra.mxu0 %v1732_v50  ;;  %v362_v40 = vld [vmem:[#allocation7 + $0xc8] sm:$0xff]  ;;  %v2425_v45 = vpack.c.bf16 %v358_v39, %v355_v38  ;;  %v361_v48 = vld [vmem:[#allocation7 + $0xc0] sm:$0xff]  ;;  %v364_v49 = vld [vmem:[#allocation7 + $0xd8] sm:$0xff]  ;;  %v2432_v52 = vpack.c.bf16 %v348_v44, %v345_v43 }
  0x64   :  { %1735 = vmatprep.subr.bf16.mxu0 %v1734_v53  ;;  %1756 = vmatpush3.bf16.msra.mxu1 %v1755_v61  ;;  %v2429_v47 = vpack.c.bf16 %v365_v41, %v362_v40  ;;  %v368_v50 = vld [vmem:[#allocation7 + $0xf8] sm:$0xff]  ;;  %v371_v51 = vld [vmem:[#allocation7 + $0x110] sm:$0xff]  ;;  %v354_v54 = vld [vmem:[#allocation7 + $0x88] sm:$0xff]  ;;  %v2438_v55 = vpack.c.bf16 %v364_v49, %v361_v48  ;;  %v147_v34 = vsub.s32 2, %v138_v33 }
  0x65   :  { %1757 = vmatprep.subr.bf16.mxu1 %v2278_v0  ;;  %v351_v53 = vld [vmem:[#allocation7 + $0x70] sm:$0xff]  ;;  %v86_v56 = vld [vmem:[#allocation2 + $0x20] sm:$0xff]  ;;  %v2442_v57 = vpack.c.bf16 %v371_v51, %v368_v50  ;;  %v374_v60 = vld [vmem:[#allocation7 + $0x128] sm:$0xff] }
  0x66   :  { %v367_v58 = vld [vmem:[#allocation7 + $0xf0] sm:$0xff]  ;;  %v377_v61 = vld [vmem:[#allocation7 + $0x140] sm:$0xff]  ;;  %v360_v2 = vld [vmem:[#allocation7 + $0xb8] sm:$0xff] }
  0x67   :  { %1737 = vmatpush1.bf16.msra.mxu0 %v1736_v59  ;;  %v370_v59 = vld [vmem:[#allocation7 + $0x108] sm:$0xff]  ;;  %v357_v63 = vld [vmem:[#allocation7 + $0xa0] sm:$0xff]  ;;  %v2455_v4 = vpack.c.bf16 %v377_v61, %v374_v60  ;;  %v383_v9 = vld [vmem:[#allocation7 + $0x170] sm:$0xff]  ;;  %v143_v60 = vsub.s32 1, %v138_v33 }
  0x68   :  { %1739 = vmatprep.subr.bf16.mxu0 %v1738_v62  ;;  %1759 = vmatpush3.bf16.msra.mxu1 %v1758_v7  ;;  %v2445_v62 = vpack.c.bf16 %v354_v54, %v351_v53  ;;  %v2451_v3 = vpack.c.bf16 %v370_v59, %v367_v58  ;;  %v373_v5 = vld [vmem:[#allocation7 + $0x120] sm:$0xff]  ;;  %v380_v7 = vld [vmem:[#allocation7 + $0x158] sm:$0xff]  ;;  %v2458_v10 = vpack.c.bf16 %v360_v2, %v357_v63  ;;  %v363_v11 = vld [vmem:[#allocation7 + $0xd0] sm:$0xff]  ;;  %v139_v54 = vsub.s32 0, %v138_v33 }
  0x69   :  { %1760 = vmatprep.subr.bf16.mxu1 %v2278_v0  ;;  %v366_v12 = vld [vmem:[#allocation7 + $0xe8] sm:$0xff]  ;;  %v2467_v14 = vpack.c.bf16 %v383_v9, %v380_v7  ;;  %v369_v20 = vld [vmem:[#allocation7 + $0x100] sm:$0xff]  ;;  %v375_v24 = vld [vmem:[#allocation7 + $0x130] sm:$0xff] }
  0x6a   :  { %v382_v18 = vld [vmem:[#allocation7 + $0x168] sm:$0xff]  ;;  %v2470_v19 = vpack.c.bf16 %v366_v12, %v363_v11  ;;  %v381_v29 = vld [vmem:[#allocation7 + $0x160] sm:$0xff] }
  0x6b   :  { %1741 = vmatpush1.bf16.msra.mxu0 %v1740_v6  ;;  %v376_v6 = vld [vmem:[#allocation7 + $0x138] sm:$0xff] }
  0x6c   :  { %1767 = vmatprep.subr.bf16.mxu0 %v2397_v8  ;;  %1762 = vmatpush3.bf16.msra.mxu1 %v1761_v21  ;;  %v2464_v13 = vpack.c.bf16 %v376_v6, %v373_v5  ;;  %v372_v21 = vld [vmem:[#allocation7 + $0x118] sm:$0xff] }
  0x6d   :  { %1763 = vmatprep.subr.bf16.mxu1 %v2278_v0  ;;  %v2480_v23 = vpack.c.bf16 %v372_v21, %v369_v20 }
  0x6e   :  { %217 = vmatmul.mubr.f32.vlgmr.msra.gmra.mrb[0].mxu0 %v82_v15 }
  0x6f   :  { %1769 = vmatpush1.bf16.msra.mxu0 %v2400_v16  ;;  %222 = vmatprep.mubr.f32.mxu0 %v2279_v1 }
  0x70   :  { %1771 = vmatprep.subr.bf16.mxu0 %v2403_v17  ;;  %1765 = vmatpush3.bf16.msra.mxu1 %v1764_v30  ;;  %v384_v30 = vld [vmem:[#allocation7 + $0x178] sm:$0xff] }
  0x71   :  { %1798 = vmatprep.subr.bf16.mxu1 %v2278_v0  ;;  %v2496_v31 = vpack.c.bf16 %v384_v30, %v381_v29 }
  0x72   :  { %223 = vmatmul.mubr.f32.gmra.mrb[2].mxu0 %v83_v26 }
  0x73   :  { %1773 = vmatpush1.bf16.msra.mxu0 %v2407_v25  ;;  %228 = vmatprep.mubr.f32.mxu0 %v2279_v1 }
  0x74   :  { %1775 = vmatprep.subr.bf16.mxu0 %v2411_v27  ;;  %1486 = vmatmul.mubr.f32.vlgmr.msra.gmra.mrb[0].mxu1 %v82_v15  ;;  %v379_v15 = vld [vmem:[#allocation7 + $0x150] sm:$0xff] }
  0x75   :  { %1800 = vmatpush3.bf16.msra.mxu1 %v2422_v42  ;;  %1488 = vmatprep.mubr.msk.f32.mxu1 %vm2280_vm0, %v2279_v1  ;;  %v2476_v22 = vpack.c.bf16 %v382_v18, %v379_v15 }
  0x76   :  { %229 = vmatmul.mubr.f32.gmra.mrb[4].mxu0 %v84_v36  ;;  %1801 = vmatprep.subr.bf16.mxu1 %v2278_v0 }
  0x77   :  { %1777 = vmatpush1.bf16.msra.mxu0 %v2415_v35  ;;  %234 = vmatprep.mubr.f32.mxu0 %v2279_v1 }
  0x78   :  { %1779 = vmatprep.subr.bf16.mxu0 %v2419_v37  ;;  %1489 = vmatmul.mubr.f32.gmra.mrb[2].mxu1 %v83_v26  ;;  %v378_v26 = vld [vmem:[#allocation7 + $0x148] sm:$0xff] }
  0x79   :  { %1803 = vmatpush3.bf16.msra.mxu1 %v2432_v52  ;;  %1491 = vmatprep.mubr.msk.f32.mxu1 %vm2280_vm0, %v2279_v1  ;;  %v2488_v28 = vpack.c.bf16 %v378_v26, %v375_v24  ;;  %v2554_v24 = vld [vmem:[%s2710_s4] ss:$0 sm:$0xff] }
  0x7a   :  { %235 = vmatmul.mubr.f32.gmra.mrb[6].mxu0 %v85_v46  ;;  %1804 = vmatprep.subr.bf16.mxu1 %v2278_v0 }
  0x7b   :  { %1781 = vmatpush1.bf16.msra.mxu0 %v2425_v45  ;;  %240 = vmatprep.mubr.f32.mxu0 %v2279_v1 }
  0x7c   :  { %1783 = vmatprep.subr.bf16.mxu0 %v2429_v47  ;;  %1492 = vmatmul.mubr.f32.gmra.mrb[4].mxu1 %v84_v36  ;;  %v135_v36 = vld [vmem:[%s2709_s3] sm:$0x7] }
  0x7d   :  { %1806 = vmatpush3.bf16.msra.mxu1 %v2445_v62  ;;  %1494 = vmatprep.mubr.msk.f32.mxu1 %vm2280_vm0, %v2279_v1  ;;  %v148_v40 = vrot.slane %v135_v36, %v147_v34  ;;  %v2545_v61 = vrot.slane %v135_v36, %v139_v54  ;;  %v2547_v2 = vrot.slane %v135_v36, %v143_v60 }
  0x7e   :  { %241 = vmatmul.mubr.f32.gmra.mrb[8].mxu0 %v86_v56  ;;  %1807 = vmatprep.subr.bf16.mxu1 %v2278_v0 }
  0x7f   :  { %1785 = vmatpush1.bf16.msra.mxu0 %v2438_v55  ;;  %456 = vmatprep.mubr.f32.mxu0 %v2279_v1 }
  0x80   :  { %1787 = vmatprep.subr.bf16.mxu0 %v2442_v57  ;;  %1495 = vmatmul.mubr.f32.gmra.mrb[6].mxu1 %v85_v46 }
  0x81   :  { %1809 = vmatpush3.bf16.msra.mxu1 %v2458_v10  ;;  %1497 = vmatprep.mubr.msk.f32.mxu1 %vm2280_vm0, %v2279_v1 }
  0x82   :  { %1810 = vmatprep.subr.bf16.mxu1 %v2278_v0 }
  0x83   :  { %1789 = vmatpush1.bf16.msra.mxu0 %v2451_v3 }
  0x84   :  { %1791 = vmatprep.subr.bf16.mxu0 %v2455_v4  ;;  %1498 = vmatmul.mubr.f32.gmra.mrb[8].mxu1 %v86_v56 }
  0x85   :  { %1812 = vmatpush3.bf16.msra.mxu1 %v2470_v19  ;;  %1532 = vmatprep.mubr.msk.f32.mxu1 %vm2280_vm0, %v2279_v1 }
  0x86   :  { %1813 = vmatprep.subr.bf16.mxu1 %v2278_v0 }
  0x87   :  { %1793 = vmatpush1.bf16.msra.mxu0 %v2464_v13 }
  0x88   :  { %1795 = vmatprep.subr.bf16.mxu0 %v2467_v14 }
  0x89   :  { %1815 = vmatpush3.bf16.msra.mxu1 %v2480_v23 }
  0x8a   :  { %1816 = vmatprep.subr.bf16.mxu1 %v2278_v0 }
  0x8b   :  { %1797 = vmatpush1.bf16.msra.mxu0 %v2476_v22 }
  0x8c   :  { %1823 = vmatprep.subr.bf16.mxu0 %v2397_v8 }
  0x8d   :  { %1818 = vmatpush3.bf16.msra.mxu1 %v2488_v28 }
  0x8e   :  { %457 = vmatmul.mubr.f32.vlgmr.msra.gmra.mrb[0].mxu0 %v2279_v1  ;;  %1819 = vmatprep.subr.bf16.mxu1 %v2278_v0 }
  0x8f   :  { %1825 = vmatpush1.bf16.msra.mxu0 %v2400_v16  ;;  %619 = vmatprep.mubr.f32.mxu0 %v2279_v1 }
  0x90   :  { %1827 = vmatprep.subr.bf16.mxu0 %v2403_v17 }
  0x91   :  { %1821 = vmatpush3.bf16.msra.mxu1 %v2496_v31 }
  0x92   :  { %1854 = vmatprep.subr.bf16.mxu1 %v2278_v0 }
  0x93   :  { %1829 = vmatpush1.bf16.msra.mxu0 %v2407_v25 }
  0x94   :  { %1831 = vmatprep.subr.bf16.mxu0 %v2411_v27  ;;  %1533 = vmatmul.mubr.f32.vlgmr.msra.gmra.mrb[10].mxu1 %v2279_v1 }
  0x95   :  { %1856 = vmatpush3.bf16.msra.mxu1 %v2422_v42  ;;  %1567 = vmatprep.mubr.msk.f32.mxu1 %vm2280_vm0, %v2279_v1 }
  0x96   :  { %1857 = vmatprep.subr.bf16.mxu1 %v2278_v0 }
  0x97   :  { %1833 = vmatpush1.bf16.msra.mxu0 %v2415_v35 }
  0x98   :  { %1835 = vmatprep.subr.bf16.mxu0 %v2419_v37 }
  0x99   :  { %1859 = vmatpush3.bf16.msra.mxu1 %v2432_v52 }
  0x9a   :  { %1860 = vmatprep.subr.bf16.mxu1 %v2278_v0 }
  0x9b   :  { %1837 = vmatpush1.bf16.msra.mxu0 %v2425_v45 }
  0x9c   :  { %1839 = vmatprep.subr.bf16.mxu0 %v2429_v47 }
  0x9d   :  { %1862 = vmatpush3.bf16.msra.mxu1 %v2445_v62 }
  0x9e   :  { %1863 = vmatprep.subr.bf16.mxu1 %v2278_v0 }
  0x9f   :  { %1841 = vmatpush1.bf16.msra.mxu0 %v2438_v55 }
  0xa0   :  { %1843 = vmatprep.subr.bf16.mxu0 %v2442_v57 }
  0xa1   :  { %1865 = vmatpush3.bf16.msra.mxu1 %v2458_v10 }
  0xa2   :  { %1866 = vmatprep.subr.bf16.mxu1 %v2278_v0 }
  0xa3   :  { %1845 = vmatpush1.bf16.msra.mxu0 %v2451_v3 }
  0xa4   :  { %1847 = vmatprep.subr.bf16.mxu0 %v2455_v4 }
  0xa5   :  { %1868 = vmatpush3.bf16.msra.mxu1 %v2470_v19 }
  0xa6   :  { %1869 = vmatprep.subr.bf16.mxu1 %v2278_v0 }
  0xa7   :  { %1849 = vmatpush1.bf16.msra.mxu0 %v2464_v13 }
  0xa8   :  { %1851 = vmatprep.subr.bf16.mxu0 %v2467_v14 }
  0xa9   :  { %1871 = vmatpush3.bf16.msra.mxu1 %v2480_v23 }
  0xaa   :  { %1872 = vmatprep.subr.bf16.mxu1 %v2278_v0 }
  0xab   :  { %1853 = vmatpush1.bf16.msra.mxu0 %v2476_v22 }
  0xac   :  { %1879 = vmatprep.subr.bf16.mxu0 %v2397_v8 }
  0xad   :  { %1874 = vmatpush3.bf16.msra.mxu1 %v2488_v28 }
  0xae   :  { %1875 = vmatprep.subr.bf16.mxu1 %v2278_v0 }
  0xb1   :  { %1877 = vmatpush3.bf16.msra.mxu1 %v2496_v31 }
  0xb2   :  { %1910 = vmatprep.subr.bf16.mxu1 %v2278_v0 }
 0x147   :  { %v313_v38 = vpop.f32.mrb[0].mxu1 }
 0x148   :  { %v1487_v39 = vpop.f32.mrb[1].mxu1  ;;  %v314_v32 = vadd.f32 %v313_v38, %v148_v40 }
 0x14b   :  { %v318_v41 = vpop.f32.mrb[2].mxu1 }
 0x14c   :  { %v2537_v43 = vadd.f32 %v318_v41, %v148_v40  ;;  %v1490_v44 = vpop.f32.mrb[3].mxu1 }
 0x14f   :  { %v323_v46 = vpop.f32.mrb[4].mxu1 }
 0x150   :  { %v2539_v48 = vadd.f32 %v323_v46, %v148_v40  ;;  %v1493_v49 = vpop.f32.mrb[5].mxu1 }
 0x153   :  { %v328_v50 = vpop.f32.mrb[6].mxu1 }
 0x154   :  { %v2541_v51 = vadd.f32 %v328_v50, %v148_v40  ;;  %v1496_v53 = vpop.f32.mrb[7].mxu1 }
 0x157   :  { %v333_v56 = vpop.f32.mrb[8].mxu1 }
 0x158   :  { %v2543_v58 = vadd.f32 %v333_v56, %v148_v40  ;;  %v1499_v59 = vpop.f32.mrb[9].mxu1 }
 0x161   :  { %v458_v63 = vpop.f32.mrb[0].mxu0 }
 0x162   :  { %v2070_v5 = vadd.f32 %v458_v63, %v2545_v61  ;;  %v460_v6 = vpop.f32.mrb[1].mxu0 }
 0x163   :  { %v2071_v9 = vadd.f32 %v460_v6, %v2547_v2 }
 0x164   :  { %v1319_v7 = vmul.f32 -1.442695, %v2070_v5 }
 0x165   :  { %v1320_v11 = vmul.f32 -1.442695, %v2071_v9 }
 0x166   :  { %2102 = vpow2.f32 %v1319_v7 }
 0x167   :  { %v529_v12 = vpop.f32.mrb[10].mxu1  ;;  %2104 = vpow2.f32 %v1320_v11 }
 0x168   :  { %v1534_v15 = vpop.f32.mrb[11].mxu1  ;;  %v547_v29 = vadd.f32 %v2554_v24, %v529_v12 }
 0x170   :  { %v2103_v18 = vpop.eup %2102 }
 0x171   :  { %v537_v20 = vadd.f32 1.0, %v2103_v18  ;;  %v2105_v21 = vpop.eup %2104 }
 0x172   :  { %v544_v26 = vadd.f32 1.0, %v2105_v21 }
 0x173   :  { %2106 = vrcp.f32 %v537_v20 }
 0x174   :  { %2108 = vrcp.f32 %v544_v26 }
 0x17d   :  { %v2107_v30 = vpop.eup %2106 }
 0x17e   :  { %v548_v33 = vmul.f32 %v2107_v30, %v547_v29  ;;  %v2109_v36 = vpop.eup %2108 }
 0x17f   :  { %v551_v39 = vsub.f32 1.0, %v2109_v36  ;;  %v553_v46 = vmul.f32 0.0, %v2109_v36 }
 0x180   :  { %v549_v34 = vadd.f32 %v548_v33, %v314_v32 }
 0x182   :  { %2110 = vtanh.f32 %v549_v34 }
 0x18c   :  { %v2111_v41 = vpop.eup %2110 }
 0x18d   :  { %v552_v44 = vmul.f32 %v2111_v41, %v551_v39 }
 0x18f   :  { %v554_v49 = vadd.f32 %v553_v46, %v552_v44 }
 0x191   :  { %620 = vmatmul.mubr.f32.vlgmr.msra.gmra.mrb[2].mxu0 %v554_v49  ;;  %1568 = vmatmul.mubr.f32.vlgmr.msra.gmra.mrb[12].mxu1 %v554_v49 }
 0x192   :  { %1881 = vmatpush1.bf16.msra.mxu0 %v2400_v16  ;;  %1912 = vmatpush3.bf16.msra.mxu1 %v2422_v42 }
 0x193   :  { %1883 = vmatprep.subr.bf16.mxu0 %v2403_v17  ;;  %1913 = vmatprep.subr.bf16.mxu1 %v2278_v0 }
 0x194   :  { %782 = vmatprep.mubr.f32.mxu0 %v2279_v1  ;;  %1602 = vmatprep.mubr.msk.f32.mxu1 %vm2280_vm0, %v2279_v1 }
 0x196   :  { %1885 = vmatpush1.bf16.msra.mxu0 %v2407_v25  ;;  %1915 = vmatpush3.bf16.msra.mxu1 %v2432_v52 }
 0x197   :  { %1887 = vmatprep.subr.bf16.mxu0 %v2411_v27  ;;  %1916 = vmatprep.subr.bf16.mxu1 %v2278_v0 }
 0x19a   :  { %1889 = vmatpush1.bf16.msra.mxu0 %v2415_v35  ;;  %1918 = vmatpush3.bf16.msra.mxu1 %v2445_v62 }
 0x19b   :  { %1891 = vmatprep.subr.bf16.mxu0 %v2419_v37  ;;  %1919 = vmatprep.subr.bf16.mxu1 %v2278_v0 }
 0x19e   :  { %1893 = vmatpush1.bf16.msra.mxu0 %v2425_v45  ;;  %1921 = vmatpush3.bf16.msra.mxu1 %v2458_v10 }
 0x19f   :  { %1895 = vmatprep.subr.bf16.mxu0 %v2429_v47  ;;  %1922 = vmatprep.subr.bf16.mxu1 %v2278_v0 }
 0x1a2   :  { %1897 = vmatpush1.bf16.msra.mxu0 %v2438_v55  ;;  %1924 = vmatpush3.bf16.msra.mxu1 %v2470_v19 }
 0x1a3   :  { %1899 = vmatprep.subr.bf16.mxu0 %v2442_v57  ;;  %1925 = vmatprep.subr.bf16.mxu1 %v2278_v0 }
 0x1a6   :  { %1901 = vmatpush1.bf16.msra.mxu0 %v2451_v3  ;;  %1927 = vmatpush3.bf16.msra.mxu1 %v2480_v23 }
 0x1a7   :  { %1903 = vmatprep.subr.bf16.mxu0 %v2455_v4  ;;  %1928 = vmatprep.subr.bf16.mxu1 %v2278_v0 }
 0x1aa   :  { %1905 = vmatpush1.bf16.msra.mxu0 %v2464_v13  ;;  %1930 = vmatpush3.bf16.msra.mxu1 %v2488_v28 }
 0x1ab   :  { %1907 = vmatprep.subr.bf16.mxu0 %v2467_v14  ;;  %1931 = vmatprep.subr.bf16.mxu1 %v2278_v0 }
 0x1ae   :  { %1909 = vmatpush1.bf16.msra.mxu0 %v2476_v22  ;;  %1933 = vmatpush3.bf16.msra.mxu1 %v2496_v31 }
 0x1af   :  { %1935 = vmatprep.subr.bf16.mxu0 %v2397_v8  ;;  %1966 = vmatprep.subr.bf16.mxu1 %v2278_v0 }
 0x264   :  { %v621_v38 = vpop.f32.mrb[2].mxu0  ;;  %v692_v40 = vpop.f32.mrb[12].mxu1 }
 0x265   :  { %v2072_v50 = vadd.f32 %v621_v38, %v2545_v61  ;;  %v623_v53 = vpop.f32.mrb[3].mxu0  ;;  %v1569_v54 = vpop.f32.mrb[13].mxu1  ;;  %v710_v9 = vadd.f32 %v2554_v24, %v692_v40 }
 0x266   :  { %v2073_v59 = vadd.f32 %v623_v53, %v2547_v2 }
 0x267   :  { %v1321_v56 = vmul.f32 -1.442695, %v2072_v50 }
 0x268   :  { %v1322_v60 = vmul.f32 -1.442695, %v2073_v59 }
 0x269   :  { %2112 = vpow2.f32 %v1321_v56 }
 0x26a   :  { %2114 = vpow2.f32 %v1322_v60 }
 0x273   :  { %v2113_v63 = vpop.eup %2112 }
 0x274   :  { %v700_v5 = vadd.f32 1.0, %v2113_v63  ;;  %v2115_v6 = vpop.eup %2114 }
 0x275   :  { %v707_v7 = vadd.f32 1.0, %v2115_v6 }
 0x276   :  { %2116 = vrcp.f32 %v700_v5 }
 0x277   :  { %2118 = vrcp.f32 %v707_v7 }
 0x280   :  { %v2117_v11 = vpop.eup %2116 }
 0x281   :  { %v711_v12 = vmul.f32 %v2117_v11, %v710_v9  ;;  %v2119_v18 = vpop.eup %2118  ;;  %v1210_v9 = vld [vmem:[#allocation8 + $0x18] sm:$0xff] }
 0x282   :  { %v714_v20 = vsub.f32 1.0, %v2119_v18  ;;  %v716_v29 = vmul.f32 %v2119_v18, %v554_v49 }
 0x283   :  { %v712_v15 = vadd.f32 %v711_v12, %v2537_v43  ;;  %v1211_v12 = vld [vmem:[#allocation8 + $0x20] sm:$0xff] }
 0x285   :  { %2120 = vtanh.f32 %v712_v15  ;;  %v1212_v15 = vld [vmem:[#allocation8 + $0x28] sm:$0xff] }
 0x286   :  { %v2053_v18 = vpack.c.bf16 %v1212_v15, %v1211_v12 }
 0x28f   :  { %v2121_v21 = vpop.eup %2120 }
 0x290   :  { %v715_v26 = vmul.f32 %v2121_v21, %v714_v20  ;;  %v1213_v20 = vld [vmem:[#allocation8 + $0x30] sm:$0xff] }
 0x292   :  { %v717_v30 = vadd.f32 %v716_v29, %v715_v26  ;;  %v1215_v26 = vld [vmem:[#allocation8 + $0x40] sm:$0xff]  ;;  %v1216_v29 = vld [vmem:[#allocation8 + $0x48] sm:$0xff] }
 0x294   :  { %783 = vmatmul.mubr.f32.vlgmr.msra.gmra.mrb[4].mxu0 %v717_v30  ;;  %1603 = vmatmul.mubr.f32.vlgmr.msra.gmra.mrb[14].mxu1 %v717_v30 }
 0x295   :  { %1937 = vmatpush1.bf16.msra.mxu0 %v2400_v16  ;;  %1968 = vmatpush3.bf16.msra.mxu1 %v2422_v42 }
 0x296   :  { %1939 = vmatprep.subr.bf16.mxu0 %v2403_v17  ;;  %1969 = vmatprep.subr.bf16.mxu1 %v2278_v0 }
 0x297   :  { %945 = vmatprep.mubr.f32.mxu0 %v2279_v1  ;;  %1637 = vmatprep.mubr.msk.f32.mxu1 %vm2280_vm0, %v2279_v1 }
 0x299   :  { %1941 = vmatpush1.bf16.msra.mxu0 %v2407_v25  ;;  %1971 = vmatpush3.bf16.msra.mxu1 %v2432_v52 }
 0x29a   :  { %1943 = vmatprep.subr.bf16.mxu0 %v2411_v27  ;;  %1972 = vmatprep.subr.bf16.mxu1 %v2278_v0 }
 0x29d   :  { %1945 = vmatpush1.bf16.msra.mxu0 %v2415_v35  ;;  %1974 = vmatpush3.bf16.msra.mxu1 %v2445_v62 }
 0x29e   :  { %1947 = vmatprep.subr.bf16.mxu0 %v2419_v37  ;;  %1975 = vmatprep.subr.bf16.mxu1 %v2278_v0 }
 0x2a1   :  { %1949 = vmatpush1.bf16.msra.mxu0 %v2425_v45  ;;  %1977 = vmatpush3.bf16.msra.mxu1 %v2458_v10 }
 0x2a2   :  { %1951 = vmatprep.subr.bf16.mxu0 %v2429_v47  ;;  %1978 = vmatprep.subr.bf16.mxu1 %v2278_v0 }
 0x2a5   :  { %1953 = vmatpush1.bf16.msra.mxu0 %v2438_v55  ;;  %1980 = vmatpush3.bf16.msra.mxu1 %v2470_v19 }
 0x2a6   :  { %1955 = vmatprep.subr.bf16.mxu0 %v2442_v57  ;;  %1981 = vmatprep.subr.bf16.mxu1 %v2278_v0 }
 0x2a9   :  { %1957 = vmatpush1.bf16.msra.mxu0 %v2451_v3  ;;  %1983 = vmatpush3.bf16.msra.mxu1 %v2480_v23 }
 0x2aa   :  { %1959 = vmatprep.subr.bf16.mxu0 %v2455_v4  ;;  %1984 = vmatprep.subr.bf16.mxu1 %v2278_v0 }
 0x2ad   :  { %1961 = vmatpush1.bf16.msra.mxu0 %v2464_v13  ;;  %1986 = vmatpush3.bf16.msra.mxu1 %v2488_v28 }
 0x2ae   :  { %1963 = vmatprep.subr.bf16.mxu0 %v2467_v14  ;;  %1987 = vmatprep.subr.bf16.mxu1 %v2278_v0 }
 0x2b1   :  { %1965 = vmatpush1.bf16.msra.mxu0 %v2476_v22  ;;  %1989 = vmatpush3.bf16.msra.mxu1 %v2496_v31 }
 0x2b2   :  { %1991 = vmatprep.subr.bf16.mxu0 %v2397_v8  ;;  %2022 = vmatprep.subr.bf16.mxu1 %v2278_v0 }
 0x367   :  { %v784_v43 = vpop.f32.mrb[4].mxu0  ;;  %v855_v32 = vpop.f32.mrb[14].mxu1 }
 0x368   :  { %v2074_v33 = vadd.f32 %v784_v43, %v2545_v61  ;;  %v786_v34 = vpop.f32.mrb[5].mxu0  ;;  %v1604_v36 = vpop.f32.mrb[15].mxu1  ;;  %v873_v8 = vadd.f32 %v2554_v24, %v855_v32  ;;  %v1217_v43 = vld [vmem:[#allocation8 + $0x50] sm:$0xff]  ;;  %v1218_v32 = vld [vmem:[#allocation8 + $0x58] sm:$0xff] }
 0x369   :  { %v2075_v41 = vadd.f32 %v786_v34, %v2547_v2  ;;  %v1219_v34 = vld [vmem:[#allocation8 + $0x60] sm:$0xff]  ;;  %v1220_v36 = vld [vmem:[#allocation8 + $0x68] sm:$0xff] }
 0x36a   :  { %v1323_v39 = vmul.f32 -1.442695, %v2074_v33  ;;  %v2062_v33 = vpack.c.bf16 %v1218_v32, %v1217_v43 }
 0x36b   :  { %v1324_v44 = vmul.f32 -1.442695, %v2075_v41  ;;  %v1221_v41 = vld [vmem:[#allocation8 + $0x70] sm:$0xff] }
 0x36c   :  { %2122 = vpow2.f32 %v1323_v39  ;;  %v2065_v39 = vpack.c.bf16 %v1220_v36, %v1219_v34 }
 0x36d   :  { %2124 = vpow2.f32 %v1324_v44  ;;  %v1222_v44 = vld [vmem:[#allocation8 + $0x78] sm:$0xff] }
 0x376   :  { %v2123_v46 = vpop.eup %2122 }
 0x377   :  { %v863_v49 = vadd.f32 1.0, %v2123_v46  ;;  %v2125_v38 = vpop.eup %2124  ;;  %v2068_v46 = vpack.c.bf16 %v1222_v44, %v1221_v41 }
 0x378   :  { %v870_v40 = vadd.f32 1.0, %v2125_v38 }
 0x379   :  { %2126 = vrcp.f32 %v863_v49 }
 0x37a   :  { %2128 = vrcp.f32 %v870_v40 }
 0x383   :  { %v2127_v50 = vpop.eup %2126 }
 0x384   :  { %v874_v53 = vmul.f32 %v2127_v50, %v873_v8  ;;  %v2129_v56 = vpop.eup %2128 }
 0x385   :  { %v877_v59 = vsub.f32 1.0, %v2129_v56  ;;  %v879_v5 = vmul.f32 %v2129_v56, %v717_v30  ;;  %v2059_v30 = vpack.c.bf16 %v1216_v29, %v1215_v26 }
 0x386   :  { %v875_v54 = vadd.f32 %v874_v53, %v2539_v48  ;;  %v1208_v48 = vld [vmem:[#allocation8 + $0x8] sm:$0xff] }
 0x388   :  { %2130 = vtanh.f32 %v875_v54 }
 0x392   :  { %v2131_v60 = vpop.eup %2130 }
 0x393   :  { %v878_v63 = vmul.f32 %v2131_v60, %v877_v59 }
 0x395   :  { %v880_v6 = vadd.f32 %v879_v5, %v878_v63 }
 0x397   :  { %946 = vmatmul.mubr.f32.vlgmr.msra.gmra.mrb[6].mxu0 %v880_v6  ;;  %1638 = vmatmul.mubr.f32.vlgmr.msra.gmra.mrb[16].mxu1 %v880_v6 }
 0x398   :  { %1993 = vmatpush1.bf16.msra.mxu0 %v2400_v16  ;;  %2024 = vmatpush3.bf16.msra.mxu1 %v2422_v42 }
 0x399   :  { %1995 = vmatprep.subr.bf16.mxu0 %v2403_v17  ;;  %2025 = vmatprep.subr.bf16.mxu1 %v2278_v0 }
 0x39a   :  { %1108 = vmatprep.mubr.f32.mxu0 %v2279_v1  ;;  %1672 = vmatprep.mubr.msk.f32.mxu1 %vm2280_vm0, %v2279_v1 }
 0x39c   :  { %1997 = vmatpush1.bf16.msra.mxu0 %v2407_v25  ;;  %2027 = vmatpush3.bf16.msra.mxu1 %v2432_v52 }
 0x39d   :  { %1999 = vmatprep.subr.bf16.mxu0 %v2411_v27  ;;  %2028 = vmatprep.subr.bf16.mxu1 %v2278_v0 }
 0x3a0   :  { %2001 = vmatpush1.bf16.msra.mxu0 %v2415_v35  ;;  %2030 = vmatpush3.bf16.msra.mxu1 %v2445_v62 }
 0x3a1   :  { %2003 = vmatprep.subr.bf16.mxu0 %v2419_v37  ;;  %2031 = vmatprep.subr.bf16.mxu1 %v2278_v0 }
 0x3a4   :  { %2005 = vmatpush1.bf16.msra.mxu0 %v2425_v45  ;;  %2033 = vmatpush3.bf16.msra.mxu1 %v2458_v10 }
 0x3a5   :  { %2007 = vmatprep.subr.bf16.mxu0 %v2429_v47  ;;  %2034 = vmatprep.subr.bf16.mxu1 %v2278_v0 }
 0x3a8   :  { %2009 = vmatpush1.bf16.msra.mxu0 %v2438_v55  ;;  %2036 = vmatpush3.bf16.msra.mxu1 %v2470_v19 }
 0x3a9   :  { %2011 = vmatprep.subr.bf16.mxu0 %v2442_v57  ;;  %2037 = vmatprep.subr.bf16.mxu1 %v2278_v0 }
 0x3ac   :  { %2013 = vmatpush1.bf16.msra.mxu0 %v2451_v3  ;;  %2039 = vmatpush3.bf16.msra.mxu1 %v2480_v23 }
 0x3ad   :  { %2015 = vmatprep.subr.bf16.mxu0 %v2455_v4  ;;  %2040 = vmatprep.subr.bf16.mxu1 %v2278_v0 }
 0x3b0   :  { %2017 = vmatpush1.bf16.msra.mxu0 %v2464_v13  ;;  %2042 = vmatpush3.bf16.msra.mxu1 %v2488_v28 }
 0x3b1   :  { %2019 = vmatprep.subr.bf16.mxu0 %v2467_v14  ;;  %2043 = vmatprep.subr.bf16.mxu1 %v2278_v0 }
 0x3b4   :  { %2021 = vmatpush1.bf16.msra.mxu0 %v2476_v22  ;;  %2045 = vmatpush3.bf16.msra.mxu1 %v2496_v31  ;;  %v1207_v31 = vld [vmem:[#allocation8] sm:$0xff] }
 0x3b5   :  { %2046 = vmatprep.subr.bf16.mxu0 %v2278_v0  ;;  %v2047_v7 = vpack.c.bf16 %v1208_v48, %v1207_v31 }
 0x46a   :  { %v947_v16 = vpop.f32.mrb[6].mxu0  ;;  %v1018_v17 = vpop.f32.mrb[16].mxu1 }
 0x46b   :  { %v2076_v25 = vadd.f32 %v947_v16, %v2545_v61  ;;  %v949_v27 = vpop.f32.mrb[7].mxu0  ;;  %v1639_v35 = vpop.f32.mrb[17].mxu1  ;;  %v1036_v62 = vadd.f32 %v2554_v24, %v1018_v17 }
 0x46c   :  { %v2077_v42 = vadd.f32 %v949_v27, %v2547_v2 }
 0x46d   :  { %v1325_v37 = vmul.f32 -1.442695, %v2076_v25 }
 0x46e   :  { %v1326_v45 = vmul.f32 -1.442695, %v2077_v42  ;;  %v1329_v42 = vld [vmem:[%s2712_s6] ss:$0 sm:$0xff] }
 0x46f   :  { %2132 = vpow2.f32 %v1325_v37 }
 0x470   :  { %2134 = vpow2.f32 %v1326_v45 }
 0x479   :  { %v2133_v47 = vpop.eup %2132 }
 0x47a   :  { %v1026_v52 = vadd.f32 1.0, %v2133_v47  ;;  %v2135_v55 = vpop.eup %2134 }
 0x47b   :  { %v1033_v57 = vadd.f32 1.0, %v2135_v55 }
 0x47c   :  { %2136 = vrcp.f32 %v1026_v52 }
 0x47d   :  { %2138 = vrcp.f32 %v1033_v57 }
 0x486   :  { %v2137_v3 = vpop.eup %2136 }
 0x487   :  { %v1037_v4 = vmul.f32 %v2137_v3, %v1036_v62  ;;  %v2139_v13 = vpop.eup %2138 }
 0x488   :  { %v1040_v14 = vsub.f32 1.0, %v2139_v13  ;;  %v1042_v23 = vmul.f32 %v2139_v13, %v880_v6 }
 0x489   :  { %v1038_v10 = vadd.f32 %v1037_v4, %v2541_v51  ;;  %v1209_v51 = vld [vmem:[#allocation8 + $0x10] sm:$0xff] }
 0x48a   :  { %v2050_v11 = vpack.c.bf16 %v1210_v9, %v1209_v51 }
 0x48b   :  { %2140 = vtanh.f32 %v1038_v10 }
 0x495   :  { %v2141_v19 = vpop.eup %2140 }
 0x496   :  { %v1041_v22 = vmul.f32 %v2141_v19, %v1040_v14 }
 0x498   :  { %v2673_v28 = vadd.f32 %v1042_v23, %v1041_v22 }
 0x49a   :  { %1109 = vmatmul.mubr.f32.vlgmr.msra.gmra.mrb[8].mxu0 %v2673_v28  ;;  %1673 = vmatmul.mubr.f32.vlgmr.msra.gmra.mrb[18].mxu1 %v2673_v28 }
 0x49b   :  { %1707 = vmatprep.mubr.msk.f32.mxu0 %vm2280_vm0, %v2279_v1  ;;  %2048 = vmatpush3.bf16.msra.mxu0 %v2047_v7  ;;  %v1214_v1 = vld [vmem:[#allocation8 + $0x38] sm:$0xff] }
 0x49c   :  { %2049 = vmatprep.subr.bf16.mxu0 %v2278_v0  ;;  %v2056_v21 = vpack.c.bf16 %v1214_v1, %v1213_v20 }
 0x49f   :  { %2051 = vmatpush3.bf16.msra.mxu0 %v2050_v11 }
 0x4a0   :  { %2052 = vmatprep.subr.bf16.mxu0 %v2278_v0 }
 0x4a3   :  { %2054 = vmatpush3.bf16.msra.mxu0 %v2053_v18 }
 0x4a4   :  { %2055 = vmatprep.subr.bf16.mxu0 %v2278_v0 }
 0x4a7   :  { %2057 = vmatpush3.bf16.msra.mxu0 %v2056_v21 }
 0x4a8   :  { %2058 = vmatprep.subr.bf16.mxu0 %v2278_v0 }
 0x4ab   :  { %2060 = vmatpush3.bf16.msra.mxu0 %v2059_v30 }
 0x4ac   :  { %2061 = vmatprep.subr.bf16.mxu0 %v2278_v0 }
 0x4af   :  { %2063 = vmatpush3.bf16.msra.mxu0 %v2062_v33 }
 0x4b0   :  { %2064 = vmatprep.subr.bf16.mxu0 %v2278_v0 }
 0x4b3   :  { %2066 = vmatpush3.bf16.msra.mxu0 %v2065_v39 }
 0x4b4   :  { %2067 = vmatprep.subr.bf16.mxu0 %v2278_v0 }
 0x4b7   :  { %2069 = vmatpush3.bf16.msra.mxu0 %v2068_v46 }
 0x56d   :  { %v1110_v49 = vpop.f32.mrb[8].mxu0  ;;  %v1181_v38 = vpop.f32.mrb[18].mxu1 }
 0x56e   :  { %v2078_v40 = vadd.f32 %v1110_v49, %v2545_v61  ;;  %v1112_v8 = vpop.f32.mrb[9].mxu0  ;;  %v1674_v50 = vpop.f32.mrb[19].mxu1  ;;  %v1199_v0 = vadd.f32 %v2554_v24, %v1181_v38 }
 0x56f   :  { %v2079_v54 = vadd.f32 %v1112_v8, %v2547_v2 }
 0x570   :  { %v1327_v53 = vmul.f32 -1.442695, %v2078_v40 }
 0x571   :  { %v1328_v56 = vmul.f32 -1.442695, %v2079_v54 }
 0x572   :  { %2142 = vpow2.f32 %v1327_v53 }
 0x573   :  { %2144 = vpow2.f32 %v1328_v56 }
 0x57c   :  { %v2143_v59 = vpop.eup %2142 }
 0x57d   :  { %v1189_v60 = vadd.f32 1.0, %v2143_v59  ;;  %v2145_v63 = vpop.eup %2144 }
 0x57e   :  { %v1196_v5 = vadd.f32 1.0, %v2145_v63 }
 0x57f   :  { %2146 = vrcp.f32 %v1189_v60 }
 0x580   :  { %2148 = vrcp.f32 %v1196_v5 }
 0x589   :  { %v2147_v6 = vpop.eup %2146 }
 0x58a   :  { %v1200_v16 = vmul.f32 %v2147_v6, %v1199_v0  ;;  %v2149_v17 = vpop.eup %2148 }
 0x58b   :  { %v1203_v25 = vsub.f32 1.0, %v2149_v17  ;;  %v1205_v35 = vmul.f32 %v2149_v17, %v2673_v28 }
 0x58c   :  { %v1201_v61 = vadd.f32 %v1200_v16, %v2543_v58 }
 0x58e   :  { %2150 = vtanh.f32 %v1201_v61 }
 0x598   :  { %v2151_v27 = vpop.eup %2150 }
 0x599   :  { %v1204_v2 = vmul.f32 %v2151_v27, %v1203_v25 }
 0x59b   :  { %v1206_v37 = vadd.f32 %v1205_v35, %v1204_v2 }
 0x59d   :  { %1708 = vmatmul.mubr.f32.vlgmr.msra.gmra.mrb[10].mxu0 %v1206_v37 }
 0x670   :  { %v1296_v24 = vpop.f32.mrb[10].mxu0 }
 0x671   :  { %v1297_v45 = vadd.f32 %v1329_v42, %v1296_v24  ;;  %v1709_v47 = vpop.f32.mrb[11].mxu0 }
 0x673   :  { %1300 = vst [vmem:[#allocation10] sm:$0xff] %v1297_v45 }
 0x674   :  { %2251 = shalt.err (!%p2248_p8)
}
 0x675   :  { %s2252_s13 = scalar_lea.hbm %s2713_s7, 128 }
 0x676   :  { %p2253_p9 = scmp.ne.s32.totalorder %s2713_s7, %s2252_s13  ;;  %p2256_p10 = scmp.lt.u32.totalorder %s2252_s13, %s2713_s7 }
 0x678   :  { %p2258_p11 = pnand %p2256_p10, %p2253_p9 }
 0x67a   :  { %2261 = shalt.err (!%p2258_p11)
}
 0x67b   :  { %1310 = dma.vmem_to_hbm [thread:$0]  %s1308_s30, 128, %s2713_s7, [#allocation4]  }
 0x67c   :  { %2268 = dma.done.wait [#allocation4], 128  }
 0x67d   :  { %2269 = vsyncadd [#allocation4], 4294967168 }
 0x67e   :  { %1314 = vsyncpa [#allocation3], 1 }
 0x67f   :  { %1315 = vsyncpa [#allocation6], 1 }
 0x680   :  { %1316 = vsyncpa [#allocation9], 1 }
 0x681   :  { %1317 = vsyncpa [#allocation4], 1 }

</bundles_post_ra>
